<compile_context>
chip_gen: v5e
topology: v5e:2x2
jax: 0.10.0
libtpu: 0.0.40
codegen_flags: <defaults>
</compile_context>

<pallas_src>
import numpy as np
import jax
import jax.numpy as jnp
from jax.experimental import pallas as pl
from jax.experimental.pallas import tpu as pltpu

_DEFAULT_SCOPED_VMEM_BYTES = 32 * 2**20   # Mosaic default scoped-VMEM limit
_VMEM_LIMIT_CAP_BYTES = 100 * 2**20


def _ortho_dft(n):
    """Ortho-normalized symmetric DFT matrix (complex128, host-side)."""
    k = np.arange(n)
    return np.exp(-2j * np.pi * np.outer(k, k) / n) / np.sqrt(n)


def _make_dc_kernel(H, W):
    """General (2-D mask) kernel:  out = d + ifft2(mask * fft2(u - d))."""

    def kernel(mask_ref, lfh_ref, lbh_ref, fwr_ref, fwi_ref, d_ref, u_ref, o_ref):
        cdt = fwr_ref.dtype                      # MXU feed dtype (f32 or bf16)

        def mm(a, b):                            # accumulate in f32
            return jnp.dot(a.astype(cdt), b.astype(cdt),
                           preferred_element_type=jnp.float32)

        d_re = d_ref[0, 0]                       # (H, W)
        d_im = d_ref[0, 1]
        x_re = u_ref[0, 0] - d_re                # diff = data_u - data
        x_im = u_ref[0, 1] - d_im

        # Row-stacked complex layout [re; im] (2H, W) along sublanes, plus its
        # "swapped" companion [-im; re]: complex products become real matmuls with
        # re/im recombination folded into the contraction / a single accumulate.
        xs = jnp.concatenate([x_re, x_im], axis=0)                        # (2H, W)
        xs_sw = jnp.concatenate([d_ref[0, 1] - u_ref[0, 1], x_re], axis=0)  # [-x_im; x_re]

        fwr = fwr_ref[...]
        fwi = fwi_ref[...]

        # 1) column (W) forward DFT:  Y = X @ F_W
        ys = mm(xs, fwr) + mm(xs_sw, fwi)                                 # [Y_re; Y_im]
        # 2) row (H) forward DFT (single K=2H matmul) + k-space mask (free VPU filler)
        ks = mm(lfh_ref[...], ys) * mask_ref[...]                         # (2H, W)
        # 3) row (H) inverse DFT (single K=2H matmul)
        cs = mm(lbh_ref[...], ks)                                         # [C_re; C_im]
        # 4) column (W) inverse DFT:  O = C @ conj(F_W)
        cs_sw = jnp.concatenate([cs[H:], -cs[:H]], axis=0)                # [C_im; -C_re]
        os = mm(cs, fwr) + mm(cs_sw, fwi)                                 # [O_re; O_im]

        o_ref[0, 0] = d_re + os[:H]
        o_ref[0, 1] = d_im + os[H:]

    return kernel


def _make_separable_dc_kernel(H, W):
    """Fast path for 1-D Cartesian masks (constant along H):
       out = d + (u - d) @ T_W,  T_W = F_W diag(m) conj(F_W)  (precomputed)."""

    def kernel(tr_ref, ti_ref, d_ref, u_ref, o_ref):
        cdt = tr_ref.dtype

        def mm(a, b):
            return jnp.dot(a.astype(cdt), b.astype(cdt),
                           preferred_element_type=jnp.float32)

        d_re = d_ref[0, 0]
        d_im = d_ref[0, 1]
        x_re = u_ref[0, 0] - d_re
        x_im = u_ref[0, 1] - d_im
        xs = jnp.concatenate([x_re, x_im], axis=0)                          # (2H, W)
        xs_sw = jnp.concatenate([d_ref[0, 1] - u_ref[0, 1], x_re], axis=0)  # [-x_im; x_re]
        os = mm(xs, tr_ref[...]) + mm(xs_sw, ti_ref[...])                   # [O_re; O_im]
        o_ref[0, 0] = d_re + os[:H]
        o_ref[0, 1] = d_im + os[H:]

    return kernel


def soft_data_consistency(data, data_u, mask, *, compute_dtype=jnp.float32):
    """data, data_u: (B, 2, H, W).  mask: (1, 1, H, W) (or (H, W)).

    compute_dtype: dtype fed to the MXU. f32 (default) keeps <=1e-5 error;
    bf16 trades ~1e-2 abs error for 3-6x matmul throughput on v6e/v7x.
    """
    B, C, H, W = data.shape
    assert C == 2 and data_u.shape == data.shape

    data = data.astype(jnp.float32)
    data_u = data_u.astype(jnp.float32)
    mask_hw = jnp.reshape(mask, (H, W)).astype(jnp.float32)

    # Host-side inspection of the mask is only possible when it is concrete
    # (a fixed module buffer, as in the PyTorch model). Under jit tracing we
    # silently use the general kernel.
    try:
        mask_np = np.asarray(mask_hw, dtype=np.float64)
    except Exception:
        mask_np = None

    fw = _ortho_dft(W)

    if mask_np is not None and bool(np.all(mask_np == mask_np[:1, :])):
        # Separable fast path: mask varies only along W -> H-transforms cancel.
        t = fw @ np.diag(mask_np[0]) @ np.conj(fw)                     # (W, W) complex
        consts = (jnp.asarray(t.real, compute_dtype),
                  jnp.asarray(t.imag, compute_dtype))
        kernel = _make_separable_dc_kernel(H, W)
        macs = B * 2 * (2 * H) * W * W                                 # 2 matmuls / elem
    else:
        fh = _ortho_dft(H)
        lfh = np.block([[fh.real, -fh.imag], [fh.imag, fh.real]])      # F_H      (left-mult)
        lbh = np.block([[fh.real, fh.imag], [-fh.imag, fh.real]])      # conj(F_H)(left-mult)
        consts = (jnp.tile(mask_hw, (2, 1)),                           # (2H, W) row-stacked mask
                  jnp.asarray(lfh, compute_dtype),
                  jnp.asarray(lbh, compute_dtype),
                  jnp.asarray(fw.real, compute_dtype),
                  jnp.asarray(fw.imag, compute_dtype))
        kernel = _make_dc_kernel(H, W)
        macs = B * (4 * (2 * H) * W * W + 2 * (2 * H) * (2 * H) * W)   # 6 matmuls / elem

    flops = 2 * macs                                                    # MAC -> FLOP (x2)
    const_bytes = sum(int(np.prod(c.shape)) * c.dtype.itemsize for c in consts)
    bytes_accessed = 3 * B * 2 * H * W * 4 + const_bytes

    per_batch = pl.BlockSpec((1, 2, H, W), lambda b: (b, 0, 0, 0))
    out_shape = jax.ShapeDtypeStruct((B, 2, H, W), jnp.float32)

    def call(single_buffer_consts):
        if single_buffer_consts:
            # Constant index_map -> never re-fetched; Buffered(1) drops the wasted
            # second pipeline buffer (halves constant VMEM; matters on v7x/64MiB).
            const_spec = lambda c: pl.BlockSpec(c.shape, lambda b: (0, 0),
                                                pipeline_mode=pl.Buffered(1))
            resident_const_bytes = const_bytes
        else:
            const_spec = lambda c: pl.BlockSpec(c.shape, lambda b: (0, 0))
            resident_const_bytes = 2 * const_bytes

        # VMEM budget: constants + 3 double-buffered (1,2,H,W) f32 I/O blocks +
        # ~12 live (2H, W) f32 temps.  Raise the scoped limit only when needed.
        io_bytes = 3 * 2 * (2 * H * W * 4)
        tmp_bytes = 12 * (2 * H) * W * 4
        est = resident_const_bytes + io_bytes + tmp_bytes
        vmem_limit = None
        if est > _DEFAULT_SCOPED_VMEM_BYTES:
            vmem_limit = int(min(est * 5 // 4, _VMEM_LIMIT_CAP_BYTES))

        return pl.pallas_call(
            kernel,
            out_shape=out_shape,
            grid_spec=pltpu.PrefetchScalarGridSpec(
                num_scalar_prefetch=0,
                grid=(B,),                      # one grid step per batch element
                in_specs=[const_spec(c) for c in consts] + [per_batch, per_batch],
                out_specs=per_batch,
            ),
            compiler_params=pltpu.CompilerParams(
                dimension_semantics=("parallel",),   # megacore: B >= 2 fills both v7x TCs
                vmem_limit_bytes=vmem_limit),
            cost_estimate=pl.CostEstimate(
                flops=int(flops), transcendentals=0,
                bytes_accessed=int(bytes_accessed)),
        )(*consts, data, data_u)

    try:
        return call(single_buffer_consts=True)
    except Exception:
        # Fallback for jax versions without BlockSpec(pipeline_mode=pl.Buffered(1)):
        # identical math, constants just stay double-buffered.
        return call(single_buffer_consts=False)


def _reference(data, data_u, mask):
    dc = data[:, 0] + 1j * data[:, 1]
    uc = data_u[:, 0] + 1j * data_u[:, 1]
    m = jnp.reshape(mask, mask.shape[-2:])
    kd = jnp.fft.fft2(dc, norm="ortho")
    ku = jnp.fft.fft2(uc, norm="ortho")
    out = jnp.fft.ifft2(kd * (1.0 - m) + ku * m, norm="ortho")
    return jnp.stack([out.real, out.imag], axis=1).astype(jnp.float32)


if __name__ == "__main__":
    B, H, W = 2, 16, 16
    k1, k2 = jax.random.split(jax.random.PRNGKey(0))
    data = jax.random.normal(k1, (B, 2, H, W), dtype=jnp.float32)
    data_u = jax.random.normal(k2, (B, 2, H, W), dtype=jnp.float32)

    # (a) 1-D Cartesian undersampling mask (constant along H) -> separable fast path.
    mask_1d = jnp.broadcast_to(
        (jnp.arange(W) % 4 == 0).astype(jnp.float32)[None, None, None, :],
        (1, 1, H, W))
    out = jax.block_until_ready(soft_data_consistency(data, data_u, mask_1d))
    np.testing.assert_allclose(np.asarray(out),
                               np.asarray(_reference(data, data_u, mask_1d)),
                               rtol=1e-4, atol=1e-4)

    # (b) genuinely 2-D mask -> general (two-sided DFT) kernel.
    hh = jnp.arange(H)[:, None]
    ww = jnp.arange(W)[None, :]
    mask_2d = (((3 * hh + ww) % 5) == 0).astype(jnp.float32)[None, None]
    out = jax.block_until_ready(soft_data_consistency(data, data_u, mask_2d))
    np.testing.assert_allclose(np.asarray(out),
                               np.asarray(_reference(data, data_u, mask_2d)),
                               rtol=1e-4, atol=1e-4)

    # (c) bf16 MXU feed (per perf review): ~1e-2 abs error, 3-6x matmul rate on v6e/v7x.
    out_bf16 = jax.block_until_ready(
        soft_data_consistency(data, data_u, mask_2d, compute_dtype=jnp.bfloat16))
    np.testing.assert_allclose(np.asarray(out_bf16),
                               np.asarray(_reference(data, data_u, mask_2d)),
                               rtol=1e-1, atol=1e-1)

    print("KERNEL_OK")
</pallas_src>

<mosaic_0001>
module attributes {stable_mosaic.version = 11 : i64} {
  func.func @kernel(%arg0: i32, %arg1: memref<16x16xf32, #tpu.memory_space<vmem>>, %arg2: memref<16x16xf32, #tpu.memory_space<vmem>>, %arg3: memref<1x2x16x16xf32, #tpu.memory_space<vmem>>, %arg4: memref<1x2x16x16xf32, #tpu.memory_space<vmem>>, %arg5: memref<1x2x16x16xf32, #tpu.memory_space<vmem>>) attributes {dimension_semantics = [#tpu.dimension_semantics<parallel>], iteration_bounds = array<i64: 2>, scalar_prefetch = 0 : i64, scratch_operands = 0 : i64, tpu.core_type = #tpu.core_type<tc>, window_params = [{pipeline_mode = #tpu.pipeline_mode<synchronous>, transform_indices = @transform_0, window_bounds = array<i64: 16, 16>}, {pipeline_mode = #tpu.pipeline_mode<synchronous>, transform_indices = @transform_1, window_bounds = array<i64: 16, 16>}, {transform_indices = @transform_2, window_bounds = array<i64: 1, 2, 16, 16>}, {transform_indices = @transform_3, window_bounds = array<i64: 1, 2, 16, 16>}, {transform_indices = @transform_4, window_bounds = array<i64: 1, 2, 16, 16>}]} {
    %c0 = arith.constant 0 : index
    %c0_0 = arith.constant 0 : index
    %c0_1 = arith.constant 0 : index
    %c0_2 = arith.constant 0 : index
    %0 = vector.load %arg3[%c0, %c0_0, %c0_1, %c0_2] : memref<1x2x16x16xf32, #tpu.memory_space<vmem>>, vector<1x1x16x16xf32>
    %1 = vector.shape_cast %0 : vector<1x1x16x16xf32> to vector<16x16xf32>
    %c0_3 = arith.constant 0 : index
    %c1 = arith.constant 1 : index
    %c0_4 = arith.constant 0 : index
    %c0_5 = arith.constant 0 : index
    %2 = vector.load %arg3[%c0_3, %c1, %c0_4, %c0_5] : memref<1x2x16x16xf32, #tpu.memory_space<vmem>>, vector<1x1x16x16xf32>
    %3 = vector.shape_cast %2 : vector<1x1x16x16xf32> to vector<16x16xf32>
    %c0_6 = arith.constant 0 : index
    %c0_7 = arith.constant 0 : index
    %c0_8 = arith.constant 0 : index
    %c0_9 = arith.constant 0 : index
    %4 = vector.load %arg4[%c0_6, %c0_7, %c0_8, %c0_9] : memref<1x2x16x16xf32, #tpu.memory_space<vmem>>, vector<1x1x16x16xf32>
    %5 = vector.shape_cast %4 : vector<1x1x16x16xf32> to vector<16x16xf32>
    %6 = arith.subf %5, %1 : vector<16x16xf32>
    %c0_10 = arith.constant 0 : index
    %c1_11 = arith.constant 1 : index
    %c0_12 = arith.constant 0 : index
    %c0_13 = arith.constant 0 : index
    %7 = vector.load %arg4[%c0_10, %c1_11, %c0_12, %c0_13] : memref<1x2x16x16xf32, #tpu.memory_space<vmem>>, vector<1x1x16x16xf32>
    %8 = vector.shape_cast %7 : vector<1x1x16x16xf32> to vector<16x16xf32>
    %9 = arith.subf %8, %3 : vector<16x16xf32>
    %10 = tpu.concatenate %6, %9 in 0 : vector<16x16xf32>, vector<16x16xf32> -> vector<32x16xf32>
    %c0_14 = arith.constant 0 : index
    %c1_15 = arith.constant 1 : index
    %c0_16 = arith.constant 0 : index
    %c0_17 = arith.constant 0 : index
    %11 = vector.load %arg3[%c0_14, %c1_15, %c0_16, %c0_17] : memref<1x2x16x16xf32, #tpu.memory_space<vmem>>, vector<1x1x16x16xf32>
    %12 = vector.shape_cast %11 : vector<1x1x16x16xf32> to vector<16x16xf32>
    %c0_18 = arith.constant 0 : index
    %c1_19 = arith.constant 1 : index
    %c0_20 = arith.constant 0 : index
    %c0_21 = arith.constant 0 : index
    %13 = vector.load %arg4[%c0_18, %c1_19, %c0_20, %c0_21] : memref<1x2x16x16xf32, #tpu.memory_space<vmem>>, vector<1x1x16x16xf32>
    %14 = vector.shape_cast %13 : vector<1x1x16x16xf32> to vector<16x16xf32>
    %15 = arith.subf %12, %14 : vector<16x16xf32>
    %16 = tpu.concatenate %15, %6 in 0 : vector<16x16xf32>, vector<16x16xf32> -> vector<32x16xf32>
    %c0_22 = arith.constant 0 : index
    %c0_23 = arith.constant 0 : index
    %17 = vector.load %arg1[%c0_22, %c0_23] : memref<16x16xf32, #tpu.memory_space<vmem>>, vector<16x16xf32>
    %cst = arith.constant dense<0.000000e+00> : vector<32x16xf32>
    %18 = tpu.matmul %10, %17, %cst {dimension_numbers = #tpu.dot_dimension_numbers<[1], [0], [0], [1], [0, 0, 1, 1], [], []>} : vector<32x16xf32>, vector<16x16xf32>, vector<32x16xf32> -> vector<32x16xf32>
    %c0_24 = arith.constant 0 : index
    %c0_25 = arith.constant 0 : index
    %19 = vector.load %arg2[%c0_24, %c0_25] : memref<16x16xf32, #tpu.memory_space<vmem>>, vector<16x16xf32>
    %cst_26 = arith.constant dense<0.000000e+00> : vector<32x16xf32>
    %20 = tpu.matmul %16, %19, %cst_26 {dimension_numbers = #tpu.dot_dimension_numbers<[1], [0], [0], [1], [0, 0, 1, 1], [], []>} : vector<32x16xf32>, vector<16x16xf32>, vector<32x16xf32> -> vector<32x16xf32>
    %21 = arith.addf %18, %20 : vector<32x16xf32>
    %22 = vector.extract_strided_slice %21 {offsets = [0, 0], sizes = [16, 16], strides = [1, 1]} : vector<32x16xf32> to vector<16x16xf32>
    %23 = arith.addf %1, %22 : vector<16x16xf32>
    %c0_27 = arith.constant 0 : index
    %c0_28 = arith.constant 0 : index
    %c0_29 = arith.constant 0 : index
    %c0_30 = arith.constant 0 : index
    %24 = vector.load %arg5[%c0_27, %c0_28, %c0_29, %c0_30] : memref<1x2x16x16xf32, #tpu.memory_space<vmem>>, vector<1x1x16x16xf32>
    %25 = vector.shape_cast %24 : vector<1x1x16x16xf32> to vector<16x16xf32>
    %26 = vector.shape_cast %23 : vector<16x16xf32> to vector<1x1x16x16xf32>
    tpu.vector_store %arg5[%c0_27, %c0_28, %c0_29, %c0_30], %26 {strides = array<i32>} : memref<1x2x16x16xf32, #tpu.memory_space<vmem>>, vector<1x1x16x16xf32>,
    %27 = vector.extract_strided_slice %21 {offsets = [16, 0], sizes = [16, 16], strides = [1, 1]} : vector<32x16xf32> to vector<16x16xf32>
    %28 = arith.addf %3, %27 : vector<16x16xf32>
    %c0_31 = arith.constant 0 : index
    %c1_32 = arith.constant 1 : index
    %c0_33 = arith.constant 0 : index
    %c0_34 = arith.constant 0 : index
    %29 = vector.load %arg5[%c0_31, %c1_32, %c0_33, %c0_34] : memref<1x2x16x16xf32, #tpu.memory_space<vmem>>, vector<1x1x16x16xf32>
    %30 = vector.shape_cast %29 : vector<1x1x16x16xf32> to vector<16x16xf32>
    %31 = vector.shape_cast %28 : vector<16x16xf32> to vector<1x1x16x16xf32>
    tpu.vector_store %arg5[%c0_31, %c1_32, %c0_33, %c0_34], %31 {strides = array<i32>} : memref<1x2x16x16xf32, #tpu.memory_space<vmem>>, vector<1x1x16x16xf32>,
    return
  }
  func.func @transform_0(%arg0: i32) -> (i32, i32) {
    %c0_i32 = arith.constant 0 : i32
    %c0_i32_0 = arith.constant 0 : i32
    %c0_i32_1 = arith.constant 0 : i32
    return %c0_i32, %c0_i32_0 : i32, i32
  }
  func.func @transform_1(%arg0: i32) -> (i32, i32) {
    %c0_i32 = arith.constant 0 : i32
    %c0_i32_0 = arith.constant 0 : i32
    %c0_i32_1 = arith.constant 0 : i32
    return %c0_i32, %c0_i32_0 : i32, i32
  }
  func.func @transform_2(%arg0: i32) -> (i32, i32, i32, i32) {
    %c0_i32 = arith.constant 0 : i32
    %c0_i32_0 = arith.constant 0 : i32
    %c0_i32_1 = arith.constant 0 : i32
    %c0_i32_2 = arith.constant 0 : i32
    return %arg0, %c0_i32, %c0_i32_0, %c0_i32_1 : i32, i32, i32, i32
  }
  func.func @transform_3(%arg0: i32) -> (i32, i32, i32, i32) {
    %c0_i32 = arith.constant 0 : i32
    %c0_i32_0 = arith.constant 0 : i32
    %c0_i32_1 = arith.constant 0 : i32
    %c0_i32_2 = arith.constant 0 : i32
    return %arg0, %c0_i32, %c0_i32_0, %c0_i32_1 : i32, i32, i32, i32
  }
  func.func @transform_4(%arg0: i32) -> (i32, i32, i32, i32) {
    %c0_i32 = arith.constant 0 : i32
    %c0_i32_0 = arith.constant 0 : i32
    %c0_i32_1 = arith.constant 0 : i32
    %c0_i32_2 = arith.constant 0 : i32
    return %arg0, %c0_i32, %c0_i32_0, %c0_i32_1 : i32, i32, i32, i32
  }
}

module attributes {stable_mosaic.version = 11 : i64} {
  func.func @kernel(%arg0: i32, %arg1: memref<16x16xf32, #tpu.memory_space<vmem>>, %arg2: memref<16x16xf32, #tpu.memory_space<vmem>>, %arg3: memref<1x2x16x16xf32, #tpu.memory_space<vmem>>, %arg4: memref<1x2x16x16xf32, #tpu.memory_space<vmem>>, %arg5: memref<1x2x16x16xf32, #tpu.memory_space<vmem>>) attributes {dimension_semantics = [#tpu.dimension_semantics<parallel>], iteration_bounds = array<i64: 2>, scalar_prefetch = 0 : i64, scratch_operands = 0 : i64, tpu.core_type = #tpu.core_type<tc>, window_params = [{pipeline_mode = #tpu.pipeline_mode<synchronous>, transform_indices = @transform_0, window_bounds = array<i64: 16, 16>}, {pipeline_mode = #tpu.pipeline_mode<synchronous>, transform_indices = @transform_1, window_bounds = array<i64: 16, 16>}, {transform_indices = @transform_2, window_bounds = array<i64: 1, 2, 16, 16>}, {transform_indices = @transform_3, window_bounds = array<i64: 1, 2, 16, 16>}, {transform_indices = @transform_4, window_bounds = array<i64: 1, 2, 16, 16>}]} {
    %c0 = arith.constant 0 : index
    %c0_0 = arith.constant 0 : index
    %c0_1 = arith.constant 0 : index
    %c0_2 = arith.constant 0 : index
    %0 = vector.load %arg3[%c0, %c0_0, %c0_1, %c0_2] : memref<1x2x16x16xf32, #tpu.memory_space<vmem>>, vector<1x1x16x16xf32>
    %1 = vector.shape_cast %0 : vector<1x1x16x16xf32> to vector<16x16xf32>
    %c0_3 = arith.constant 0 : index
    %c1 = arith.constant 1 : index
    %c0_4 = arith.constant 0 : index
    %c0_5 = arith.constant 0 : index
    %2 = vector.load %arg3[%c0_3, %c1, %c0_4, %c0_5] : memref<1x2x16x16xf32, #tpu.memory_space<vmem>>, vector<1x1x16x16xf32>
    %3 = vector.shape_cast %2 : vector<1x1x16x16xf32> to vector<16x16xf32>
    %c0_6 = arith.constant 0 : index
    %c0_7 = arith.constant 0 : index
    %c0_8 = arith.constant 0 : index
    %c0_9 = arith.constant 0 : index
    %4 = vector.load %arg4[%c0_6, %c0_7, %c0_8, %c0_9] : memref<1x2x16x16xf32, #tpu.memory_space<vmem>>, vector<1x1x16x16xf32>
    %5 = vector.shape_cast %4 : vector<1x1x16x16xf32> to vector<16x16xf32>
    %6 = arith.subf %5, %1 : vector<16x16xf32>
    %c0_10 = arith.constant 0 : index
    %c1_11 = arith.constant 1 : index
    %c0_12 = arith.constant 0 : index
    %c0_13 = arith.constant 0 : index
    %7 = vector.load %arg4[%c0_10, %c1_11, %c0_12, %c0_13] : memref<1x2x16x16xf32, #tpu.memory_space<vmem>>, vector<1x1x16x16xf32>
    %8 = vector.shape_cast %7 : vector<1x1x16x16xf32> to vector<16x16xf32>
    %9 = arith.subf %8, %3 : vector<16x16xf32>
    %10 = tpu.concatenate %6, %9 in 0 : vector<16x16xf32>, vector<16x16xf32> -> vector<32x16xf32>
    %c0_14 = arith.constant 0 : index
    %c1_15 = arith.constant 1 : index
    %c0_16 = arith.constant 0 : index
    %c0_17 = arith.constant 0 : index
    %11 = vector.load %arg3[%c0_14, %c1_15, %c0_16, %c0_17] : memref<1x2x16x16xf32, #tpu.memory_space<vmem>>, vector<1x1x16x16xf32>
    %12 = vector.shape_cast %11 : vector<1x1x16x16xf32> to vector<16x16xf32>
    %c0_18 = arith.constant 0 : index
    %c1_19 = arith.constant 1 : index
    %c0_20 = arith.constant 0 : index
    %c0_21 = arith.constant 0 : index
    %13 = vector.load %arg4[%c0_18, %c1_19, %c0_20, %c0_21] : memref<1x2x16x16xf32, #tpu.memory_space<vmem>>, vector<1x1x16x16xf32>
    %14 = vector.shape_cast %13 : vector<1x1x16x16xf32> to vector<16x16xf32>
    %15 = arith.subf %12, %14 : vector<16x16xf32>
    %16 = tpu.concatenate %15, %6 in 0 : vector<16x16xf32>, vector<16x16xf32> -> vector<32x16xf32>
    %c0_22 = arith.constant 0 : index
    %c0_23 = arith.constant 0 : index
    %17 = vector.load %arg1[%c0_22, %c0_23] : memref<16x16xf32, #tpu.memory_space<vmem>>, vector<16x16xf32>
    %cst = arith.constant dense<0.000000e+00> : vector<32x16xf32>
    %18 = tpu.matmul %10, %17, %cst {dimension_numbers = #tpu.dot_dimension_numbers<[1], [0], [0], [1], [0, 0, 1, 1], [], []>} : vector<32x16xf32>, vector<16x16xf32>, vector<32x16xf32> -> vector<32x16xf32>
    %c0_24 = arith.constant 0 : index
    %c0_25 = arith.constant 0 : index
    %19 = vector.load %arg2[%c0_24, %c0_25] : memref<16x16xf32, #tpu.memory_space<vmem>>, vector<16x16xf32>
    %cst_26 = arith.constant dense<0.000000e+00> : vector<32x16xf32>
    %20 = tpu.matmul %16, %19, %cst_26 {dimension_numbers = #tpu.dot_dimension_numbers<[1], [0], [0], [1], [0, 0, 1, 1], [], []>} : vector<32x16xf32>, vector<16x16xf32>, vector<32x16xf32> -> vector<32x16xf32>
    %21 = arith.addf %18, %20 : vector<32x16xf32>
    %22 = vector.extract_strided_slice %21 {offsets = [0, 0], sizes = [16, 16], strides = [1, 1]} : vector<32x16xf32> to vector<16x16xf32>
    %23 = arith.addf %1, %22 : vector<16x16xf32>
    %c0_27 = arith.constant 0 : index
    %c0_28 = arith.constant 0 : index
    %c0_29 = arith.constant 0 : index
    %c0_30 = arith.constant 0 : index
    %24 = vector.load %arg5[%c0_27, %c0_28, %c0_29, %c0_30] : memref<1x2x16x16xf32, #tpu.memory_space<vmem>>, vector<1x1x16x16xf32>
    %25 = vector.shape_cast %24 : vector<1x1x16x16xf32> to vector<16x16xf32>
    %26 = vector.shape_cast %23 : vector<16x16xf32> to vector<1x1x16x16xf32>
    tpu.vector_store %arg5[%c0_27, %c0_28, %c0_29, %c0_30], %26 {strides = array<i32>} : memref<1x2x16x16xf32, #tpu.memory_space<vmem>>, vector<1x1x16x16xf32>,
    %27 = vector.extract_strided_slice %21 {offsets = [16, 0], sizes = [16, 16], strides = [1, 1]} : vector<32x16xf32> to vector<16x16xf32>
    %28 = arith.addf %3, %27 : vector<16x16xf32>
    %c0_31 = arith.constant 0 : index
    %c1_32 = arith.constant 1 : index
    %c0_33 = arith.constant 0 : index
    %c0_34 = arith.constant 0 : index
    %29 = vector.load %arg5[%c0_31, %c1_32, %c0_33, %c0_34] : memref<1x2x16x16xf32, #tpu.memory_space<vmem>>, vector<1x1x16x16xf32>
    %30 = vector.shape_cast %29 : vector<1x1x16x16xf32> to vector<16x16xf32>
    %31 = vector.shape_cast %28 : vector<16x16xf32> to vector<1x1x16x16xf32>
    tpu.vector_store %arg5[%c0_31, %c1_32, %c0_33, %c0_34], %31 {strides = array<i32>} : memref<1x2x16x16xf32, #tpu.memory_space<vmem>>, vector<1x1x16x16xf32>,
    return
  }
  func.func @transform_0(%arg0: i32) -> (i32, i32) {
    %c0_i32 = arith.constant 0 : i32
    %c0_i32_0 = arith.constant 0 : i32
    %c0_i32_1 = arith.constant 0 : i32
    return %c0_i32, %c0_i32_0 : i32, i32
  }
  func.func @transform_1(%arg0: i32) -> (i32, i32) {
    %c0_i32 = arith.constant 0 : i32
    %c0_i32_0 = arith.constant 0 : i32
    %c0_i32_1 = arith.constant 0 : i32
    return %c0_i32, %c0_i32_0 : i32, i32
  }
  func.func @transform_2(%arg0: i32) -> (i32, i32, i32, i32) {
    %c0_i32 = arith.constant 0 : i32
    %c0_i32_0 = arith.constant 0 : i32
    %c0_i32_1 = arith.constant 0 : i32
    %c0_i32_2 = arith.constant 0 : i32
    return %arg0, %c0_i32, %c0_i32_0, %c0_i32_1 : i32, i32, i32, i32
  }
  func.func @transform_3(%arg0: i32) -> (i32, i32, i32, i32) {
    %c0_i32 = arith.constant 0 : i32
    %c0_i32_0 = arith.constant 0 : i32
    %c0_i32_1 = arith.constant 0 : i32
    %c0_i32_2 = arith.constant 0 : i32
    return %arg0, %c0_i32, %c0_i32_0, %c0_i32_1 : i32, i32, i32, i32
  }
  func.func @transform_4(%arg0: i32) -> (i32, i32, i32, i32) {
    %c0_i32 = arith.constant 0 : i32
    %c0_i32_0 = arith.constant 0 : i32
    %c0_i32_1 = arith.constant 0 : i32
    %c0_i32_2 = arith.constant 0 : i32
    return %arg0, %c0_i32, %c0_i32_0, %c0_i32_1 : i32, i32, i32, i32
  }
}

</mosaic_0001>

<bundles_post_ra>
// kernel: tpu_custom_call.1
= control target key start
LH: loop header
LB: loop body
LE: loop exit
PB: predicated region body
PF: predicated region fallthrough
CT: control target
= control target key end

     0   :  { %s1082_s0 = inlined_call_operand.hbm [shape: f32[16,16], index: 0, kind: input, shape index: {}]   ;;  %s1083_s1 = inlined_call_operand.hbm [shape: f32[16,16], index: 1, kind: input, shape index: {}]   ;;  %s1084_s2 = inlined_call_operand.hbm [shape: f32[2,2,16,16], index: 2, kind: input, shape index: {}]   ;;  %s1085_s3 = inlined_call_operand.hbm [shape: f32[2,2,16,16], index: 3, kind: input, shape index: {}]   ;;  %s1086_s4 = inlined_call_operand.hbm [shape: f32[2,2,16,16], index: 4, kind: output, shape index: {}]  }
   0x1   :  { %1093 = sst [smem:[#allocation15_spill]] %s1082_s0 }
   0x2   :  { %1094 = sst [smem:[#allocation16_spill]] %s1083_s1 }
   0x3   :  { %1095 = sst [smem:[#allocation17_spill]] %s1084_s2 }
   0x4   :  { %9 = vsyncpa [#allocation3], 0 }
   0x5   :  { %10 = vsyncpa [#allocation6], 0 }
   0x6   :  { %11 = vsyncpa [#allocation4], 0 }
   0x7   :  { %13 = vsyncpa [#allocation4 + $0x1], 0  ;;  %s868_s15 = smov 0   ;;  %s870_s16 = smov 0  }
   0x8   :  { %s872_s17 = smov 0   ;;  %s874_s18 = smov 0  }
   0x9 LB: > { %s889_s19 = sadd.s32 4294967295, %s835_s18   ;;  %s522_s20 = sadd.s32 4294967294, %s835_s18   ;;  %s835_s18 = sphi %s874_s18, %s1118_s18   ;;  %s831_s17 = sphi %s872_s17, %s1117_s17   ;;  %s827_s16 = sphi %s870_s16, %s1116_s16   ;;  %s823_s15 = sphi %s868_s15, %s1115_s15  }
   0xa   : > { %p81_p0 = scmp.ne.s32.totalorder %s827_s16, %s823_s15  ;;  %p1092_p1 = scmp.eq.s32.totalorder %s889_s19, 0 }
   0xb   : > { %p131_p2 = scmp.eq.s32.totalorder %s889_s19, 1  ;;  %p137_p3 = scmp.eq.s32.totalorder %s522_s20, 1 }
   0xc   : > { %p898_p4 = por %p1092_p1, %p81_p0  ;;  %p523_p5 = scmp.ge.s32.totalorder %s835_s18, 1 }
   0xd   : > { %p903_p6 = por %p137_p3, %p81_p0  ;;  %p144_p7 = scmp.lt.s32.totalorder %s835_s18, 3 }
   0xe   : > { %s1098_s0 = sld [smem:[#allocation15_spill]]  ;;  %s837_s27 = smov [#allocation2]  }
   0xf   : > { %p911_p8 = pnand %p523_p5, %p144_p7  ;;  %s157_s28 = sshll.u32 %s837_s27, 4  ;;  %s158_s28 = int_to_ptr.vmem [resolvable:$true] %s157_s28 }
  0x10   : > { %s925_s30 = sadd.s32 1, %s835_s18   ;;  %s1087_s5 = smov 128  }
  0x11   : > { %p579_p9 = pneg %p911_p8  ;;  %s1089_s6 = smov 8  }
  0x12   : > { %s65_s7 = ssub.s32 %s835_s18, %s925_s30  ;;  %s68_s8 = sadd.s32 1, %s831_s17 }
  0x13   : > { %p919_p10 = pnand %p579_p9, %p1092_p1  ;;  %p66_p12 = scmp.eq.s32.totalorder %s65_s7, 0 }
  0x14   : > { %s155_s25 = sshll.u32 %s1098_s0, 4  ;;  %p75_p13 = scmp.ne.s32.totalorder %s831_s17, %s827_s16  ;;  %s156_s25 = int_to_ptr.hbm [resolvable:$true] %s155_s25 }
  0x15   : > { %582 = dma.hbm_to_vmem [thread:$0]  (!%p919_p10), %s156_s25, 256, %s158_s28, [#allocation3], %s1087_s5, %s1087_s5, %s1089_s6  }
  0x16   : > { %p76_p0 = scmp.eq.s32.totalorder %s835_s18, 0  ;;  %p599_p3 = scmp.lt.s32.totalorder %s835_s18, 2 }
  0x17   : > { %s940_s9 = scalar_select %p66_p12, %s831_s17, %s68_s8  }
  0x18   : > { %p77_p5 = por %p76_p0, %p75_p13  ;;  %p944_p7 = por %p131_p2, %p75_p13 }
  0x19   : > { %1101 = sst [smem:[#allocation14_spill]] %s940_s9  ;;  %s185_s11 = sand.u32 1, %s835_s18  }
  0x1a   : > { %s187_s12 = sand.u32 1, %s831_s17   ;;  %s1091_s14 = sshll.u32 %s835_s18, 5 }
  0x1b   : > { %s950_s13 = sshll.u32 %s187_s12, 5  ;;  %s1103_s2 = sld [smem:[#allocation17_spill]] }
  0x1c   : > { %s189_s25 = scalar_lea.vmem [#allocation7], %s950_s13  ;;  %p961_p2 = pnand %p599_p3, %p77_p5 }
  0x1d   : > { %s197_s27 = sshll.u32 %s189_s25, 4  ;;  %s1105_s1 = sld [smem:[#allocation16_spill]]  ;;  %s198_s27 = int_to_ptr.vmem [resolvable:$true] %s197_s27 }
  0x1e   : > { %s968_s6 = scalar_lea.sflag [#allocation3], %s185_s11  ;;  %p675_p12 = pneg %p961_p2 }
  0x21   : > { %s194_s24 = scalar_lea.hbm %s1103_s2, %s1091_s14  ;;  %s678_s8 = scalar_lea.hbm %s1103_s2, 64 }
  0x22   : > { %s195_s28 = sshll.u32 %s194_s24, 4  ;;  %s196_s28 = int_to_ptr.hbm [resolvable:$true] %s195_s28 }
  0x23   : > { %s169_s5 = sshll.u32 %s1105_s1, 4  ;;  %s671_s20 = sshra.s32 %s196_s28, 4  ;;  %s170_s5 = int_to_ptr.hbm [resolvable:$true] %s169_s5  ;;  %s672_s20 = int_to_ptr.hbm [resolvable:$true] %s671_s20 }
  0x24   : > { %s673_s23 = scalar_lea.hbm %s672_s20, 32  ;;  %p679_p3 = scmp.lt.s32.totalorder %s672_s20, %s1103_s2 }
  0x25   : > { %p674_p9 = scmp.ne.s32.totalorder %s672_s20, %s673_s23  ;;  %p680_p5 = scmp.lt.s32.totalorder %s678_s8, %s673_s23 }
  0x27   : > { %p676_p13 = pnand %p675_p12, %p674_p9  ;;  %p681_p11 = por %p680_p5, %p679_p3 }
  0x29   : > { %p677_p0 = pneg %p676_p13 }
  0x2b   : > { %p682_p1 = pnand %p681_p11, %p677_p0 }
  0x2d   : > { %685 = shalt.err (!%p682_p1)
}
  0x2e   : > { %s1106_s11 = smov 8   ;;  %s1107_s0 = smov 128  }
  0x2f   : > { %589 = dma.hbm_to_vmem [thread:$0]  (!%p961_p2), %s196_s28, 512, %s198_s27, %s968_s6, %s1107_s0, %s1107_s0, %s1106_s11  }
  0x30   : > { %s840_s24 = smov [#allocation5]   ;;  %s1108_s14 = sshll.u32 %s835_s18, 5 }
  0x31   : > { %s171_s25 = sshll.u32 %s840_s24, 4  ;;  %s216_s8 = scalar_lea.hbm %s1085_s3, %s1108_s14  ;;  %s172_s25 = int_to_ptr.vmem [resolvable:$true] %s171_s25 }
  0x32   : > { %585 = dma.hbm_to_vmem [thread:$0]  (!%p919_p10), %s170_s5, 256, %s172_s25, [#allocation6], %s1107_s0, %s1107_s0, %s1106_s11  }
  0x33   : > { %s217_s12 = sshll.u32 %s216_s8, 4  ;;  %s211_s1 = scalar_lea.vmem [#allocation8], %s950_s13  ;;  %s218_s12 = int_to_ptr.hbm [resolvable:$true] %s217_s12 }
  0x34   : > { %s219_s2 = sshll.u32 %s211_s1, 4  ;;  %s731_s9 = sshra.s32 %s218_s12, 4  ;;  %s220_s2 = int_to_ptr.vmem [resolvable:$true] %s219_s2  ;;  %s732_s9 = int_to_ptr.hbm [resolvable:$true] %s731_s9 }
  0x35   : > { %s733_s27 = scalar_lea.hbm %s732_s9, 32  ;;  %s738_s29 = scalar_lea.hbm %s1085_s3, 64 }
  0x36   : > { %p734_p1 = scmp.ne.s32.totalorder %s732_s9, %s733_s27  ;;  %p739_p10 = scmp.lt.s32.totalorder %s732_s9, %s1085_s3 }
  0x37   : > { %p740_p13 = scmp.lt.s32.totalorder %s738_s29, %s733_s27 }
  0x38   : > { %p736_p11 = pnand %p734_p1, %p675_p12 }
  0x39   : > { %p741_p0 = por %p740_p13, %p739_p10 }
  0x3a   : > { %p737_p9 = pneg %p736_p11 }
  0x3c   : > { %p742_p3 = pnand %p741_p0, %p737_p9 }
  0x3e   : > { %745 = shalt.err (!%p742_p3)
}
  0x3f   : > { %592 = dma.hbm_to_vmem [thread:$0]  (!%p961_p2), %s218_s12, 512, %s220_s2, %s968_s6, %s1107_s0, %s1107_s0, %s1106_s11  }
  0x40   : > { %231 = sbr.rel (%p911_p8) target bundleno = 232 (0xe8), region = 36  ;;  %p1109_p12 = scmp.eq.s32.totalorder (!%p911_p8), %s889_s19, 0 }
  0x45   : > { %806 = dma.done.wait (%p1109_p12), [#allocation3], 256   ;;  %p1110_p5 = pmov %p1109_p12 }
  0x47   : > { %808 = vsyncadd (%p1110_p5), [#allocation3], 4294967040  ;;  %p1111_p1 = pmov %p1110_p5 }
  0x49   : > { %810 = dma.done.wait (%p1111_p1), [#allocation6], 256   ;;  %p1112_p11 = pmov %p1111_p1 }
  0x4a   : > { %s243_s0 = sand.u32 1, %s889_s19   ;;  %s245_s1 = sand.u32 1, %s827_s16  }
  0x4b   : > { %812 = vsyncadd (%p1112_p11), [#allocation6], 4294967040  ;;  %s1027_s2 = sshll.u32 %s245_s1, 5  ;;  %s244_s26 = scalar_lea.sflag [#allocation3], %s243_s0 }
  0x4c   : > { %s247_s5 = scalar_lea.vmem [#allocation7], %s1027_s2 }
  0x4d   : > { %814 = dma.done.wait (%p898_p4), %s244_s26, 1024  }
  0x4e   : > { %816 = vsyncadd (%p898_p4), %s244_s26, 4294966272  ;;  %v307_v0 = vld [vmem:[#allocation5 + $0x8] sm:$0xff]  ;;  %v305_v1 = vld [vmem:[#allocation2 + $0x8] sm:$0xff]  ;;  %s257_s6 = scalar_lea.vmem [#allocation8], %s1027_s2  ;;  %vm308_vm0 = vcmask 130048   ;;  %s287_s21 = scalar_lea.vmem [#allocation9], %s1027_s2 }
  0x4f   : > { %v306_v2 = vld [vmem:[#allocation5] sm:$0xff]  ;;  %561 = vmatpush.msra.mxu2 %v307_v0  ;;  %563 = vmatpush.msra.mxu3 %v305_v1  ;;  %v304_v3 = vld [vmem:[#allocation2] sm:$0xff]  ;;  %v289_v11 = vld [vmem:[%s247_s5 + $0x8] sm:$0xff]  ;;  %s560_s9 = sshll.u32 %s889_s19, 5  ;;  %s407_s25 = sshll.u32 %s287_s21, 4  ;;  %s408_s25 = int_to_ptr.vmem [resolvable:$true] %s407_s25 }
  0x50   : > { %v288_v4 = vld [vmem:[%s247_s5] sm:$0xff]  ;;  %v539_v7 = vld [vmem:[%s247_s5 + $0x10] sm:$0xff]  ;;  %335 = vmatpush.msra.mxu0 %v307_v0  ;;  %370 = vmatpush.msra.mxu1 %v305_v1  ;;  %v294_v12 = vld [vmem:[%s257_s6 + $0x8] sm:$0xff]  ;;  %s406_s11 = scalar_lea.hbm %s1086_s4, %s560_s9  ;;  %s395_s19 = scalar_lea.sflag [#allocation4], %s245_s1 }
  0x51   : > { %v293_v5 = vld [vmem:[%s257_s6] sm:$0xff]  ;;  %v541_v8 = vld [vmem:[%s257_s6 + $0x10] sm:$0xff]  ;;  %562 = vmatpush.msra.mxu2 %v306_v2  ;;  %564 = vmatpush.msra.mxu3 %v304_v3  ;;  %v540_v13 = vld [vmem:[%s247_s5 + $0x18] sm:$0xff]  ;;  %v296_v15 = vsub.f32 %v294_v12, %v289_v11  ;;  %s409_s23 = sshll.u32 %s406_s11, 4  ;;  %s781_s24 = scalar_lea.hbm %s1086_s4, 64  ;;  %s410_s23 = int_to_ptr.hbm [resolvable:$true] %s409_s23 }
  0x52   : > { %v295_v6 = vsub.f32 %v293_v5, %v288_v4  ;;  %v300_v9 = vsub.f32 %v541_v8, %v539_v7  ;;  %v302_v10 = vsub.f32 %v539_v7, %v541_v8  ;;  %336 = vmatpush.msra.mxu0 %v306_v2  ;;  %371 = vmatpush.msra.mxu1 %v304_v3  ;;  %v542_v14 = vld [vmem:[%s257_s6 + $0x18] sm:$0xff]  ;;  %s775_s8 = sshra.s32 %s410_s23, 4  ;;  %s776_s8 = int_to_ptr.hbm [resolvable:$true] %s775_s8 }
  0x53   : > { %v301_v16 = vsub.f32 %v542_v14, %v540_v13  ;;  %v303_v17 = vsub.f32 %v540_v13, %v542_v14  ;;  %s777_s12 = scalar_lea.hbm %s776_s8, 32  ;;  %p782_p9 = scmp.lt.s32.totalorder %s776_s8, %s1086_s4 }
  0x54   : > { %545 = vmatmul.msk.f32.vlgmr.msra.gmra.mxu2 %vm308_vm0, %v295_v6  ;;  %549 = vmatmul.msk.f32.vlgmr.msra.gmra.mxu3 %vm308_vm0, %v300_v9  ;;  %p778_p4 = scmp.ne.s32.totalorder %s776_s8, %s777_s12  ;;  %p783_p10 = scmp.lt.s32.totalorder %s781_s24, %s777_s12 }
  0x55   : > { %543 = vmatmul.msk.f32.vlgmr.msra.gmra.mxu0 %vm308_vm0, %v302_v10  ;;  %547 = vmatmul.msk.f32.vlgmr.msra.gmra.mxu1 %vm308_vm0, %v295_v6 }
  0x56   : > { %p779_p8 = pnand %p778_p4, %p944_p7  ;;  %p784_p13 = por %p783_p10, %p782_p9 }
  0x58   : > { %p780_p2 = pneg %p779_p8 }
  0x5a   : > { %p785_p0 = pnand %p784_p13, %p780_p2 }
  0x5c   : > { %546 = vmatmul.msk.f32.gmra.mxu2 %vm308_vm0, %v296_v15  ;;  %550 = vmatmul.msk.f32.gmra.mxu3 %vm308_vm0, %v301_v16 }
  0x5d   : > { %544 = vmatmul.msk.f32.gmra.mxu0 %vm308_vm0, %v303_v17  ;;  %548 = vmatmul.msk.f32.gmra.mxu1 %vm308_vm0, %v296_v15 }
  0xd2   : > { %v338_v18 = vpop.f32.mrf.mxu0  ;;  %v373_v19 = vpop.f32.mrf.mxu1 }
  0xd3   : > { %v374_v20 = vadd.f32 %v373_v19, %v338_v18 }
  0xd5   : > { %v385_v21 = vadd.f32 %v374_v20, %v288_v4 }
  0xd7   : > { %v344_v22 = vpop.f32.mrf.mxu2  ;;  %387 = vst.msk [vmem:[%s287_s21] sm:$0xff] %vm308_vm0, %v385_v21  ;;  %v379_v23 = vpop.f32.mrf.mxu3 }
  0xd8   : > { %v380_v24 = vadd.f32 %v379_v23, %v344_v22 }
  0xda   : > { %v389_v25 = vadd.f32 %v539_v7, %v380_v24  ;;  %v341_v26 = vpop.f32.mrf.mxu0  ;;  %v376_v27 = vpop.f32.mrf.mxu1 }
  0xdb   : > { %v377_v28 = vadd.f32 %v376_v27, %v341_v26 }
  0xdc   : > { %551 = vst.msk [vmem:[%s287_s21 + $0x10] sm:$0xff] %vm308_vm0, %v389_v25 }
  0xdd   : > { %v386_v29 = vadd.f32 %v377_v28, %v289_v11 }
  0xdf   : > { %v347_v30 = vpop.f32.mrf.mxu2  ;;  %388 = vst.msk [vmem:[%s287_s21 + $0x8] sm:$0xff] %vm308_vm0, %v386_v29  ;;  %v382_v31 = vpop.f32.mrf.mxu3 }
  0xe0   : > { %v383_v32 = vadd.f32 %v382_v31, %v347_v30 }
  0xe2   : > { %v390_v33 = vadd.f32 %v540_v13, %v383_v32 }
  0xe4   : > { %552 = vst.msk [vmem:[%s287_s21 + $0x18] sm:$0xff] %vm308_vm0, %v390_v33 }
  0xe5   : > { %788 = shalt.err (!%p785_p0)
}
  0xe6   : > { %s841_s20 = smov 128   ;;  %s842_s0 = smov 8  }
  0xe7   : > { %577 = dma.vmem_to_hbm [thread:$0]  (%p944_p7), %s408_s25, 512, %s410_s23, %s395_s19, %s841_s20, %s841_s20, %s842_s0  }
  0xe8 PF: > { %s424_s1 = sand.u32 1, %s823_s15   ;;  %p1113_p3 = scmp.ge.s32.totalorder %s835_s18, 2 }
  0xe9   : > { %s425_s2 = scalar_lea.sflag [#allocation4], %s424_s1 }
  0xea   : > { %p594_p12 = pnand %p1113_p3, %p903_p6 }
  0xec   : > { %p595_p5 = pneg %p594_p12 }
  0xee   : > { %818 = dma.done.wait (%p595_p5), %s425_s2, 512  }
  0xef   : > { %820 = vsyncadd (%p595_p5), %s425_s2, 4294966784  ;;  %s1114_s26 = sld [smem:[#allocation14_spill]]  ;;  %p16_p1 = scmp.ge.s32.totalorder %s925_s30, 4  }
  0xf0   : > { %s1115_s15 = smov %s827_s16  ;;  %s1116_s16 = smov %s831_s17 }
  0xf1   : > { %s1118_s18 = smov %s925_s30  ;;  %18 = sbr.rel (!%p16_p1) target bundleno = 9 (0x9), region = 102 }
  0xf5   : > { %s1117_s17 = smov %s1114_s26 }
  0xf6   :  { %431 = vsyncpa [#allocation3], 1 }
  0xf7   :  { %433 = vsyncpa [#allocation3 + $0x1], 1 }
  0xf8   :  { %434 = vsyncpa [#allocation6], 1 }
  0xf9   :  { %435 = vsyncpa [#allocation4], 1 }
  0xfa   :  { %437 = vsyncpa [#allocation4 + $0x1], 1 }

// kernel: tpu_custom_call.1
= control target key start
LH: loop header
LB: loop body
LE: loop exit
PB: predicated region body
PF: predicated region fallthrough
CT: control target
= control target key end

     0   :  { %s1082_s0 = inlined_call_operand.hbm [shape: f32[16,16], index: 0, kind: input, shape index: {}]   ;;  %s1083_s1 = inlined_call_operand.hbm [shape: f32[16,16], index: 1, kind: input, shape index: {}]   ;;  %s1084_s2 = inlined_call_operand.hbm [shape: f32[2,2,16,16], index: 2, kind: input, shape index: {}]   ;;  %s1085_s3 = inlined_call_operand.hbm [shape: f32[2,2,16,16], index: 3, kind: input, shape index: {}]   ;;  %s1086_s4 = inlined_call_operand.hbm [shape: f32[2,2,16,16], index: 4, kind: output, shape index: {}]  }
   0x1   :  { %1093 = sst [smem:[#allocation15_spill]] %s1082_s0 }
   0x2   :  { %1094 = sst [smem:[#allocation16_spill]] %s1083_s1 }
   0x3   :  { %1095 = sst [smem:[#allocation17_spill]] %s1084_s2 }
   0x4   :  { %9 = vsyncpa [#allocation3], 0 }
   0x5   :  { %10 = vsyncpa [#allocation6], 0 }
   0x6   :  { %11 = vsyncpa [#allocation4], 0 }
   0x7   :  { %13 = vsyncpa [#allocation4 + $0x1], 0  ;;  %s868_s15 = smov 0   ;;  %s870_s16 = smov 0  }
   0x8   :  { %s872_s17 = smov 0   ;;  %s874_s18 = smov 0  }
   0x9 LB: > { %s889_s19 = sadd.s32 4294967295, %s835_s18   ;;  %s522_s20 = sadd.s32 4294967294, %s835_s18   ;;  %s835_s18 = sphi %s874_s18, %s1118_s18   ;;  %s831_s17 = sphi %s872_s17, %s1117_s17   ;;  %s827_s16 = sphi %s870_s16, %s1116_s16   ;;  %s823_s15 = sphi %s868_s15, %s1115_s15  }
   0xa   : > { %p81_p0 = scmp.ne.s32.totalorder %s827_s16, %s823_s15  ;;  %p1092_p1 = scmp.eq.s32.totalorder %s889_s19, 0 }
   0xb   : > { %p131_p2 = scmp.eq.s32.totalorder %s889_s19, 1  ;;  %p137_p3 = scmp.eq.s32.totalorder %s522_s20, 1 }
   0xc   : > { %p898_p4 = por %p1092_p1, %p81_p0  ;;  %p523_p5 = scmp.ge.s32.totalorder %s835_s18, 1 }
   0xd   : > { %p903_p6 = por %p137_p3, %p81_p0  ;;  %p144_p7 = scmp.lt.s32.totalorder %s835_s18, 3 }
   0xe   : > { %s1098_s0 = sld [smem:[#allocation15_spill]]  ;;  %s837_s27 = smov [#allocation2]  }
   0xf   : > { %p911_p8 = pnand %p523_p5, %p144_p7  ;;  %s157_s28 = sshll.u32 %s837_s27, 4  ;;  %s158_s28 = int_to_ptr.vmem [resolvable:$true] %s157_s28 }
  0x10   : > { %s925_s30 = sadd.s32 1, %s835_s18   ;;  %s1087_s5 = smov 128  }
  0x11   : > { %p579_p9 = pneg %p911_p8  ;;  %s1089_s6 = smov 8  }
  0x12   : > { %s65_s7 = ssub.s32 %s835_s18, %s925_s30  ;;  %s68_s8 = sadd.s32 1, %s831_s17 }
  0x13   : > { %p919_p10 = pnand %p579_p9, %p1092_p1  ;;  %p66_p12 = scmp.eq.s32.totalorder %s65_s7, 0 }
  0x14   : > { %s155_s25 = sshll.u32 %s1098_s0, 4  ;;  %p75_p13 = scmp.ne.s32.totalorder %s831_s17, %s827_s16  ;;  %s156_s25 = int_to_ptr.hbm [resolvable:$true] %s155_s25 }
  0x15   : > { %582 = dma.hbm_to_vmem [thread:$0]  (!%p919_p10), %s156_s25, 256, %s158_s28, [#allocation3], %s1087_s5, %s1087_s5, %s1089_s6  }
  0x16   : > { %p76_p0 = scmp.eq.s32.totalorder %s835_s18, 0  ;;  %p599_p3 = scmp.lt.s32.totalorder %s835_s18, 2 }
  0x17   : > { %s940_s9 = scalar_select %p66_p12, %s831_s17, %s68_s8  }
  0x18   : > { %p77_p5 = por %p76_p0, %p75_p13  ;;  %p944_p7 = por %p131_p2, %p75_p13 }
  0x19   : > { %1101 = sst [smem:[#allocation14_spill]] %s940_s9  ;;  %s185_s11 = sand.u32 1, %s835_s18  }
  0x1a   : > { %s187_s12 = sand.u32 1, %s831_s17   ;;  %s1091_s14 = sshll.u32 %s835_s18, 5 }
  0x1b   : > { %s950_s13 = sshll.u32 %s187_s12, 5  ;;  %s1103_s2 = sld [smem:[#allocation17_spill]] }
  0x1c   : > { %s189_s25 = scalar_lea.vmem [#allocation7], %s950_s13  ;;  %p961_p2 = pnand %p599_p3, %p77_p5 }
  0x1d   : > { %s197_s27 = sshll.u32 %s189_s25, 4  ;;  %s1105_s1 = sld [smem:[#allocation16_spill]]  ;;  %s198_s27 = int_to_ptr.vmem [resolvable:$true] %s197_s27 }
  0x1e   : > { %s968_s6 = scalar_lea.sflag [#allocation3], %s185_s11  ;;  %p675_p12 = pneg %p961_p2 }
  0x21   : > { %s194_s24 = scalar_lea.hbm %s1103_s2, %s1091_s14  ;;  %s678_s8 = scalar_lea.hbm %s1103_s2, 64 }
  0x22   : > { %s195_s28 = sshll.u32 %s194_s24, 4  ;;  %s196_s28 = int_to_ptr.hbm [resolvable:$true] %s195_s28 }
  0x23   : > { %s169_s5 = sshll.u32 %s1105_s1, 4  ;;  %s671_s20 = sshra.s32 %s196_s28, 4  ;;  %s170_s5 = int_to_ptr.hbm [resolvable:$true] %s169_s5  ;;  %s672_s20 = int_to_ptr.hbm [resolvable:$true] %s671_s20 }
  0x24   : > { %s673_s23 = scalar_lea.hbm %s672_s20, 32  ;;  %p679_p3 = scmp.lt.s32.totalorder %s672_s20, %s1103_s2 }
  0x25   : > { %p674_p9 = scmp.ne.s32.totalorder %s672_s20, %s673_s23  ;;  %p680_p5 = scmp.lt.s32.totalorder %s678_s8, %s673_s23 }
  0x27   : > { %p676_p13 = pnand %p675_p12, %p674_p9  ;;  %p681_p11 = por %p680_p5, %p679_p3 }
  0x29   : > { %p677_p0 = pneg %p676_p13 }
  0x2b   : > { %p682_p1 = pnand %p681_p11, %p677_p0 }
  0x2d   : > { %685 = shalt.err (!%p682_p1)
}
  0x2e   : > { %s1106_s11 = smov 8   ;;  %s1107_s0 = smov 128  }
  0x2f   : > { %589 = dma.hbm_to_vmem [thread:$0]  (!%p961_p2), %s196_s28, 512, %s198_s27, %s968_s6, %s1107_s0, %s1107_s0, %s1106_s11  }
  0x30   : > { %s840_s24 = smov [#allocation5]   ;;  %s1108_s14 = sshll.u32 %s835_s18, 5 }
  0x31   : > { %s171_s25 = sshll.u32 %s840_s24, 4  ;;  %s216_s8 = scalar_lea.hbm %s1085_s3, %s1108_s14  ;;  %s172_s25 = int_to_ptr.vmem [resolvable:$true] %s171_s25 }
  0x32   : > { %585 = dma.hbm_to_vmem [thread:$0]  (!%p919_p10), %s170_s5, 256, %s172_s25, [#allocation6], %s1107_s0, %s1107_s0, %s1106_s11  }
  0x33   : > { %s217_s12 = sshll.u32 %s216_s8, 4  ;;  %s211_s1 = scalar_lea.vmem [#allocation8], %s950_s13  ;;  %s218_s12 = int_to_ptr.hbm [resolvable:$true] %s217_s12 }
  0x34   : > { %s219_s2 = sshll.u32 %s211_s1, 4  ;;  %s731_s9 = sshra.s32 %s218_s12, 4  ;;  %s220_s2 = int_to_ptr.vmem [resolvable:$true] %s219_s2  ;;  %s732_s9 = int_to_ptr.hbm [resolvable:$true] %s731_s9 }
  0x35   : > { %s733_s27 = scalar_lea.hbm %s732_s9, 32  ;;  %s738_s29 = scalar_lea.hbm %s1085_s3, 64 }
  0x36   : > { %p734_p1 = scmp.ne.s32.totalorder %s732_s9, %s733_s27  ;;  %p739_p10 = scmp.lt.s32.totalorder %s732_s9, %s1085_s3 }
  0x37   : > { %p740_p13 = scmp.lt.s32.totalorder %s738_s29, %s733_s27 }
  0x38   : > { %p736_p11 = pnand %p734_p1, %p675_p12 }
  0x39   : > { %p741_p0 = por %p740_p13, %p739_p10 }
  0x3a   : > { %p737_p9 = pneg %p736_p11 }
  0x3c   : > { %p742_p3 = pnand %p741_p0, %p737_p9 }
  0x3e   : > { %745 = shalt.err (!%p742_p3)
}
  0x3f   : > { %592 = dma.hbm_to_vmem [thread:$0]  (!%p961_p2), %s218_s12, 512, %s220_s2, %s968_s6, %s1107_s0, %s1107_s0, %s1106_s11  }
  0x40   : > { %231 = sbr.rel (%p911_p8) target bundleno = 232 (0xe8), region = 36  ;;  %p1109_p12 = scmp.eq.s32.totalorder (!%p911_p8), %s889_s19, 0 }
  0x45   : > { %806 = dma.done.wait (%p1109_p12), [#allocation3], 256   ;;  %p1110_p5 = pmov %p1109_p12 }
  0x47   : > { %808 = vsyncadd (%p1110_p5), [#allocation3], 4294967040  ;;  %p1111_p1 = pmov %p1110_p5 }
  0x49   : > { %810 = dma.done.wait (%p1111_p1), [#allocation6], 256   ;;  %p1112_p11 = pmov %p1111_p1 }
  0x4a   : > { %s243_s0 = sand.u32 1, %s889_s19   ;;  %s245_s1 = sand.u32 1, %s827_s16  }
  0x4b   : > { %812 = vsyncadd (%p1112_p11), [#allocation6], 4294967040  ;;  %s1027_s2 = sshll.u32 %s245_s1, 5  ;;  %s244_s26 = scalar_lea.sflag [#allocation3], %s243_s0 }
  0x4c   : > { %s247_s5 = scalar_lea.vmem [#allocation7], %s1027_s2 }
  0x4d   : > { %814 = dma.done.wait (%p898_p4), %s244_s26, 1024  }
  0x4e   : > { %816 = vsyncadd (%p898_p4), %s244_s26, 4294966272  ;;  %v307_v0 = vld [vmem:[#allocation5 + $0x8] sm:$0xff]  ;;  %v305_v1 = vld [vmem:[#allocation2 + $0x8] sm:$0xff]  ;;  %s257_s6 = scalar_lea.vmem [#allocation8], %s1027_s2  ;;  %vm308_vm0 = vcmask 130048   ;;  %s287_s21 = scalar_lea.vmem [#allocation9], %s1027_s2 }
  0x4f   : > { %v306_v2 = vld [vmem:[#allocation5] sm:$0xff]  ;;  %561 = vmatpush.msra.mxu2 %v307_v0  ;;  %563 = vmatpush.msra.mxu3 %v305_v1  ;;  %v304_v3 = vld [vmem:[#allocation2] sm:$0xff]  ;;  %v289_v11 = vld [vmem:[%s247_s5 + $0x8] sm:$0xff]  ;;  %s560_s9 = sshll.u32 %s889_s19, 5  ;;  %s407_s25 = sshll.u32 %s287_s21, 4  ;;  %s408_s25 = int_to_ptr.vmem [resolvable:$true] %s407_s25 }
  0x50   : > { %v288_v4 = vld [vmem:[%s247_s5] sm:$0xff]  ;;  %v539_v7 = vld [vmem:[%s247_s5 + $0x10] sm:$0xff]  ;;  %335 = vmatpush.msra.mxu0 %v307_v0  ;;  %370 = vmatpush.msra.mxu1 %v305_v1  ;;  %v294_v12 = vld [vmem:[%s257_s6 + $0x8] sm:$0xff]  ;;  %s406_s11 = scalar_lea.hbm %s1086_s4, %s560_s9  ;;  %s395_s19 = scalar_lea.sflag [#allocation4], %s245_s1 }
  0x51   : > { %v293_v5 = vld [vmem:[%s257_s6] sm:$0xff]  ;;  %v541_v8 = vld [vmem:[%s257_s6 + $0x10] sm:$0xff]  ;;  %562 = vmatpush.msra.mxu2 %v306_v2  ;;  %564 = vmatpush.msra.mxu3 %v304_v3  ;;  %v540_v13 = vld [vmem:[%s247_s5 + $0x18] sm:$0xff]  ;;  %v296_v15 = vsub.f32 %v294_v12, %v289_v11  ;;  %s409_s23 = sshll.u32 %s406_s11, 4  ;;  %s781_s24 = scalar_lea.hbm %s1086_s4, 64  ;;  %s410_s23 = int_to_ptr.hbm [resolvable:$true] %s409_s23 }
  0x52   : > { %v295_v6 = vsub.f32 %v293_v5, %v288_v4  ;;  %v300_v9 = vsub.f32 %v541_v8, %v539_v7  ;;  %v302_v10 = vsub.f32 %v539_v7, %v541_v8  ;;  %336 = vmatpush.msra.mxu0 %v306_v2  ;;  %371 = vmatpush.msra.mxu1 %v304_v3  ;;  %v542_v14 = vld [vmem:[%s257_s6 + $0x18] sm:$0xff]  ;;  %s775_s8 = sshra.s32 %s410_s23, 4  ;;  %s776_s8 = int_to_ptr.hbm [resolvable:$true] %s775_s8 }
  0x53   : > { %v301_v16 = vsub.f32 %v542_v14, %v540_v13  ;;  %v303_v17 = vsub.f32 %v540_v13, %v542_v14  ;;  %s777_s12 = scalar_lea.hbm %s776_s8, 32  ;;  %p782_p9 = scmp.lt.s32.totalorder %s776_s8, %s1086_s4 }
  0x54   : > { %545 = vmatmul.msk.f32.vlgmr.msra.gmra.mxu2 %vm308_vm0, %v295_v6  ;;  %549 = vmatmul.msk.f32.vlgmr.msra.gmra.mxu3 %vm308_vm0, %v300_v9  ;;  %p778_p4 = scmp.ne.s32.totalorder %s776_s8, %s777_s12  ;;  %p783_p10 = scmp.lt.s32.totalorder %s781_s24, %s777_s12 }
  0x55   : > { %543 = vmatmul.msk.f32.vlgmr.msra.gmra.mxu0 %vm308_vm0, %v302_v10  ;;  %547 = vmatmul.msk.f32.vlgmr.msra.gmra.mxu1 %vm308_vm0, %v295_v6 }
  0x56   : > { %p779_p8 = pnand %p778_p4, %p944_p7  ;;  %p784_p13 = por %p783_p10, %p782_p9 }
  0x58   : > { %p780_p2 = pneg %p779_p8 }
  0x5a   : > { %p785_p0 = pnand %p784_p13, %p780_p2 }
  0x5c   : > { %546 = vmatmul.msk.f32.gmra.mxu2 %vm308_vm0, %v296_v15  ;;  %550 = vmatmul.msk.f32.gmra.mxu3 %vm308_vm0, %v301_v16 }
  0x5d   : > { %544 = vmatmul.msk.f32.gmra.mxu0 %vm308_vm0, %v303_v17  ;;  %548 = vmatmul.msk.f32.gmra.mxu1 %vm308_vm0, %v296_v15 }
  0xd2   : > { %v338_v18 = vpop.f32.mrf.mxu0  ;;  %v373_v19 = vpop.f32.mrf.mxu1 }
  0xd3   : > { %v374_v20 = vadd.f32 %v373_v19, %v338_v18 }
  0xd5   : > { %v385_v21 = vadd.f32 %v374_v20, %v288_v4 }
  0xd7   : > { %v344_v22 = vpop.f32.mrf.mxu2  ;;  %387 = vst.msk [vmem:[%s287_s21] sm:$0xff] %vm308_vm0, %v385_v21  ;;  %v379_v23 = vpop.f32.mrf.mxu3 }
  0xd8   : > { %v380_v24 = vadd.f32 %v379_v23, %v344_v22 }
  0xda   : > { %v389_v25 = vadd.f32 %v539_v7, %v380_v24  ;;  %v341_v26 = vpop.f32.mrf.mxu0  ;;  %v376_v27 = vpop.f32.mrf.mxu1 }
  0xdb   : > { %v377_v28 = vadd.f32 %v376_v27, %v341_v26 }
  0xdc   : > { %551 = vst.msk [vmem:[%s287_s21 + $0x10] sm:$0xff] %vm308_vm0, %v389_v25 }
  0xdd   : > { %v386_v29 = vadd.f32 %v377_v28, %v289_v11 }
  0xdf   : > { %v347_v30 = vpop.f32.mrf.mxu2  ;;  %388 = vst.msk [vmem:[%s287_s21 + $0x8] sm:$0xff] %vm308_vm0, %v386_v29  ;;  %v382_v31 = vpop.f32.mrf.mxu3 }
  0xe0   : > { %v383_v32 = vadd.f32 %v382_v31, %v347_v30 }
  0xe2   : > { %v390_v33 = vadd.f32 %v540_v13, %v383_v32 }
  0xe4   : > { %552 = vst.msk [vmem:[%s287_s21 + $0x18] sm:$0xff] %vm308_vm0, %v390_v33 }
  0xe5   : > { %788 = shalt.err (!%p785_p0)
}
  0xe6   : > { %s841_s20 = smov 128   ;;  %s842_s0 = smov 8  }
  0xe7   : > { %577 = dma.vmem_to_hbm [thread:$0]  (%p944_p7), %s408_s25, 512, %s410_s23, %s395_s19, %s841_s20, %s841_s20, %s842_s0  }
  0xe8 PF: > { %s424_s1 = sand.u32 1, %s823_s15   ;;  %p1113_p3 = scmp.ge.s32.totalorder %s835_s18, 2 }
  0xe9   : > { %s425_s2 = scalar_lea.sflag [#allocation4], %s424_s1 }
  0xea   : > { %p594_p12 = pnand %p1113_p3, %p903_p6 }
  0xec   : > { %p595_p5 = pneg %p594_p12 }
  0xee   : > { %818 = dma.done.wait (%p595_p5), %s425_s2, 512  }
  0xef   : > { %820 = vsyncadd (%p595_p5), %s425_s2, 4294966784  ;;  %s1114_s26 = sld [smem:[#allocation14_spill]]  ;;  %p16_p1 = scmp.ge.s32.totalorder %s925_s30, 4  }
  0xf0   : > { %s1115_s15 = smov %s827_s16  ;;  %s1116_s16 = smov %s831_s17 }
  0xf1   : > { %s1118_s18 = smov %s925_s30  ;;  %18 = sbr.rel (!%p16_p1) target bundleno = 9 (0x9), region = 102 }
  0xf5   : > { %s1117_s17 = smov %s1114_s26 }
  0xf6   :  { %431 = vsyncpa [#allocation3], 1 }
  0xf7   :  { %433 = vsyncpa [#allocation3 + $0x1], 1 }
  0xf8   :  { %434 = vsyncpa [#allocation6], 1 }
  0xf9   :  { %435 = vsyncpa [#allocation4], 1 }
  0xfa   :  { %437 = vsyncpa [#allocation4 + $0x1], 1 }

</bundles_post_ra>
